<compile_context>
chip_gen: v7x
topology: tpu7x:2x2x1
jax: 0.10.0
libtpu: 0.0.40
codegen_flags: <defaults>
</compile_context>

<pallas_src>
import jax
import jax.numpy as jnp
from jax.experimental import pallas as pl
from jax.experimental.pallas import tpu as pltpu


def _edge_loss_kernel(yp_ref, yp_top_ref, yp_bot_ref,
                      yt_ref, yt_top_ref, yt_bot_ref, out_ref):
    TH, W = yp_ref.shape           # (row-tile, width), batch/channel squeezed
    HALO = yp_top_ref.shape[0]     # halo block height (8 when H is aligned)

    r = pl.program_id(1)
    # Scalar float gates: zero out the (clamped, garbage) halo rows at the
    # global image border -- that is exactly the conv's padding=1 zero halo.
    top_gate = 1.0 - (r == 0).astype(jnp.float32)
    bot_gate = 1.0 - (r == pl.num_programs(1) - 1).astype(jnp.float32)

    # Boundary masks, computed once per grid step and reused for both images
    # and both stencil directions.
    row_idx = jax.lax.broadcasted_iota(jnp.int32, (TH, W), 0)
    col_idx = jax.lax.broadcasted_iota(jnp.int32, (TH, W), 1)
    not_first_row = row_idx >= 1
    not_last_row = row_idx < TH - 1
    not_first_col = col_idx >= 1
    not_last_col = col_idx < W - 1

    def laplace_edge(x_ref, top_ref, bot_ref):
        x = x_ref[...].astype(jnp.float32)
        # Row just above / below this tile (zeroed at the image border).
        top_row = top_ref[HALO - 1:HALO, :].astype(jnp.float32) * top_gate  # (1, W)
        bot_row = bot_ref[0:1, :].astype(jnp.float32) * bot_gate            # (1, W)

        # Separable 3x3 box sum: vertical 3-row sum, then horizontal 3-col sum.
        # pltpu.roll runs on the XLU slot; the wrapped row is replaced by the
        # halo row, the wrapped column by zero.
        above = jnp.where(not_first_row, pltpu.roll(x, shift=1, axis=0), top_row)
        below = jnp.where(not_last_row, pltpu.roll(x, shift=TH - 1, axis=0), bot_row)
        v = x + above + below
        left = jnp.where(not_first_col, pltpu.roll(v, shift=1, axis=1), 0.0)
        right = jnp.where(not_last_col, pltpu.roll(v, shift=W - 1, axis=1), 0.0)
        box = v + left + right
        # Laplace [[-1,-1,-1],[-1,8,-1],[-1,-1,-1]], padding=1:
        #   8*center - (box - center) = 9*center - box.
        return jnp.abs(jnp.tanh(9.0 * x - box))

    labels = laplace_edge(yt_ref, yt_top_ref, yt_bot_ref)   # y_true_edge
    logits = laplace_edge(yp_ref, yp_top_ref, yp_bot_ref)   # y_pred_edge

    # cross_entropy terms; logits in [0,1] so exp(-logits) cannot overflow.
    terms = (1.0 - labels) * logits + jnp.log1p(jnp.exp(-logits))

    # Vreg-dense partial: fold sublane groups with plain VPU adds (no XLU
    # cross-sublane reduce, no masked single-row store).
    if TH % 8 == 0:
        partial = terms[0:8, :]
        for g in range(1, TH // 8):
            partial = partial + terms[8 * g:8 * (g + 1), :]
        out_ref[...] = partial
    else:
        out_ref[...] = jnp.sum(terms, axis=0, keepdims=True)


def _vmem_limit_bytes():
    try:
        cap = int(pltpu.get_tpu_info().vmem_capacity_bytes)
        if cap > 0:
            return int(0.85 * cap)     # leave headroom for Mosaic internal scratch
    except Exception:
        pass
    return 54 * 1024 * 1024            # ~85% of v7x's 64 MiB physical VMEM


def _pick_row_tile(H, W, B, tile_budget_bytes):
    """Largest multiple-of-8 divisor of H that fits the VMEM budget, shrunk when
    possible so the (batch x row-tile) grid has enough blocks to feed both v7x
    TensorCores and a few pipeline stages."""
    if H % 8 != 0:
        return H                       # unaligned H: one full-extent plane per block
    # ~20 live f32 (TH, W) planes: 2 double-buffered input streams + halos +
    # iota/mask/stencil/edge/terms temporaries.
    max_rows = max(8, (tile_budget_bytes // (20 * 4 * max(W, 1))) // 8 * 8)
    divisors = [d for d in range(8, H + 1, 8) if H % d == 0]
    fitting = [d for d in divisors if d <= max_rows] or [8]
    enough = [d for d in fitting if (H // d) * B >= 8]
    return max(enough) if enough else min(fitting)


def edge_loss(y_pred, y_true):
    """y_pred, y_true: (N, 1, H, W) (PyTorch NCHW convention), any float dtype."""
    assert y_pred.shape == y_true.shape and y_pred.shape[1] == 1
    B, _, H, W = y_pred.shape

    vmem_limit = _vmem_limit_bytes()
    TH = _pick_row_tile(H, W, B, vmem_limit // 2)
    R = pl.cdiv(H, TH)                 # == H // TH except in the unaligned fallback (R == 1)
    HALO = min(8, H)                   # halo block height (8-row aligned when possible)
    nb = max(TH // HALO, 1)            # halo blocks per row tile
    last_halo_block = max(pl.cdiv(H, HALO) - 1, 0)
    PR = 8 if TH % 8 == 0 else 1       # rows of the per-block partial-sum slab

    # Main (TH, W) slab of each image.
    main_spec = pl.BlockSpec((None, None, TH, W), lambda b, r: (b, 0, r, 0))
    # Halo blocks: last HALO rows of the previous tile / first HALO rows of the
    # next tile, read from the same HBM array.  At the image border the index
    # is clamped and the garbage rows are gated off in-kernel.
    top_spec = pl.BlockSpec((None, None, HALO, W),
                            lambda b, r: (b, 0, jnp.maximum(r * nb - 1, 0), 0))
    bot_spec = pl.BlockSpec((None, None, HALO, W),
                            lambda b, r: (b, 0, jnp.minimum((r + 1) * nb, last_halo_block), 0))

    in_itemsize = jnp.dtype(y_pred.dtype).itemsize
    cost = pl.CostEstimate(
        flops=int(34 * B * H * W),
        transcendentals=int(4 * B * H * W),
        bytes_accessed=int(2 * B * H * W * in_itemsize + B * R * PR * W * 4))

    partials = pl.pallas_call(
        _edge_loss_kernel,
        out_shape=jax.ShapeDtypeStruct((B, R, PR, W), jnp.float32),
        grid=(B, R),
        in_specs=[main_spec, top_spec, bot_spec,     # y_pred (+ its halos)
                  main_spec, top_spec, bot_spec],    # y_true (+ its halos)
        out_specs=pl.BlockSpec((None, None, PR, W), lambda b, r: (b, r, 0, 0)),
        compiler_params=pltpu.CompilerParams(
            dimension_semantics=("parallel", "parallel"),
            vmem_limit_bytes=int(vmem_limit)),
        cost_estimate=cost,
    )(y_pred, y_pred, y_pred, y_true, y_true, y_true)

    # Final small reduce in XLA; multiply by a precomputed reciprocal (no divide).
    return jnp.sum(partials) * (1.0 / (B * H * W))


def _edge_loss_ref(y_pred, y_true):
    """Pure-JAX reference matching the PyTorch forward exactly."""
    k = jnp.array([[-1., -1., -1.],
                   [-1.,  8., -1.],
                   [-1., -1., -1.]], jnp.float32).reshape(1, 1, 3, 3)

    def lap(x):
        e = jax.lax.conv_general_dilated(
            x.astype(jnp.float32), k, window_strides=(1, 1),
            padding=((1, 1), (1, 1)),
            dimension_numbers=("NCHW", "OIHW", "NCHW"))
        return jnp.abs(jnp.tanh(e))

    labels = lap(y_true)
    logits = lap(y_pred)
    return jnp.mean((1.0 - labels) * logits + jnp.log(1.0 + jnp.exp(-logits)))


if __name__ == "__main__":
    key = jax.random.PRNGKey(0)
    k1, k2 = jax.random.split(key)
    # EdgeLoss requires C == 1 (Laplace weight is [1,1,3,3]); spatial dims kept
    # small but lane/sublane aligned (W multiple of 128, H multiple of 8).
    # With these shapes the wrapper picks TH=16 -> grid (2, 4), which exercises
    # the row-tile halo path (interior and boundary tiles).
    N, C, H, W = 2, 1, 64, 128
    y_pred = jax.random.normal(k1, (N, C, H, W), dtype=jnp.float32)
    y_true = jax.random.uniform(k2, (N, C, H, W), dtype=jnp.float32)

    loss = jax.block_until_ready(edge_loss(y_pred, y_true))
    ref = jax.block_until_ready(_edge_loss_ref(y_pred, y_true))

    assert jnp.isfinite(loss), "non-finite loss"
    assert jnp.allclose(loss, ref, rtol=1e-5, atol=1e-5), (loss, ref)
    print("KERNEL_OK")
</pallas_src>

<mosaic_0001>
module attributes {stable_mosaic.version = 11 : i64} {
  func.func @_edge_loss_kernel(%arg0: i32, %arg1: i32, %arg2: memref<1x1x16x128xf32, #tpu.memory_space<vmem>>, %arg3: memref<1x1x8x128xf32, #tpu.memory_space<vmem>>, %arg4: memref<1x1x8x128xf32, #tpu.memory_space<vmem>>, %arg5: memref<1x1x16x128xf32, #tpu.memory_space<vmem>>, %arg6: memref<1x1x8x128xf32, #tpu.memory_space<vmem>>, %arg7: memref<1x1x8x128xf32, #tpu.memory_space<vmem>>, %arg8: memref<1x1x8x128xf32, #tpu.memory_space<vmem>>) attributes {dimension_semantics = [#tpu.dimension_semantics<parallel>, #tpu.dimension_semantics<parallel>], iteration_bounds = array<i64: 2, 4>, scalar_prefetch = 0 : i64, scratch_operands = 0 : i64, tpu.core_type = #tpu.core_type<tc>, window_params = [{transform_indices = @transform_0, window_bounds = array<i64: 1, 1, 16, 128>}, {transform_indices = @transform_1, window_bounds = array<i64: 1, 1, 8, 128>}, {transform_indices = @transform_2, window_bounds = array<i64: 1, 1, 8, 128>}, {transform_indices = @transform_3, window_bounds = array<i64: 1, 1, 16, 128>}, {transform_indices = @transform_4, window_bounds = array<i64: 1, 1, 8, 128>}, {transform_indices = @transform_5, window_bounds = array<i64: 1, 1, 8, 128>}, {transform_indices = @transform_6, window_bounds = array<i64: 1, 1, 8, 128>}]} {
    %c0_i32 = arith.constant 0 : i32
    %0 = arith.cmpi eq, %arg1, %c0_i32 : i32
    %1 = arith.extui %0 : i1 to i32
    %2 = arith.sitofp %1 : i32 to f32
    %cst = arith.constant 1.000000e+00 : f32
    %3 = arith.subf %cst, %2 : f32
    %c3_i32 = arith.constant 3 : i32
    %4 = arith.cmpi eq, %arg1, %c3_i32 : i32
    %5 = arith.extui %4 : i1 to i32
    %6 = arith.sitofp %5 : i32 to f32
    %cst_0 = arith.constant 1.000000e+00 : f32
    %7 = arith.subf %cst_0, %6 : f32
    %8 = tpu.iota {dimensions = array<i32: 0>} : vector<16x128xi32>
    %9 = tpu.iota {dimensions = array<i32: 1>} : vector<16x128xi32>
    %c1_i32 = arith.constant 1 : i32
    %10 = vector.broadcast %c1_i32 : i32 to vector<16x128xi32>
    %11 = arith.cmpi sge, %8, %10 : vector<16x128xi32>
    %c15_i32 = arith.constant 15 : i32
    %12 = vector.broadcast %c15_i32 : i32 to vector<16x128xi32>
    %13 = arith.cmpi slt, %8, %12 : vector<16x128xi32>
    %c1_i32_1 = arith.constant 1 : i32
    %14 = vector.broadcast %c1_i32_1 : i32 to vector<16x128xi32>
    %15 = arith.cmpi sge, %9, %14 : vector<16x128xi32>
    %c127_i32 = arith.constant 127 : i32
    %16 = vector.broadcast %c127_i32 : i32 to vector<16x128xi32>
    %17 = arith.cmpi slt, %9, %16 : vector<16x128xi32>
    %c0 = arith.constant 0 : index
    %c0_2 = arith.constant 0 : index
    %c0_3 = arith.constant 0 : index
    %c0_4 = arith.constant 0 : index
    %18 = vector.load %arg5[%c0, %c0_2, %c0_3, %c0_4] : memref<1x1x16x128xf32, #tpu.memory_space<vmem>>, vector<1x1x16x128xf32>
    %19 = vector.shape_cast %18 : vector<1x1x16x128xf32> to vector<16x128xf32>
    %c0_5 = arith.constant 0 : index
    %c0_6 = arith.constant 0 : index
    %c7 = arith.constant 7 : index
    %c0_7 = arith.constant 0 : index
    %20 = vector.load %arg6[%c0_5, %c0_6, %c7, %c0_7] : memref<1x1x8x128xf32, #tpu.memory_space<vmem>>, vector<1x1x1x128xf32>
    %21 = vector.shape_cast %20 : vector<1x1x1x128xf32> to vector<1x128xf32>
    %22 = vector.broadcast %3 : f32 to vector<1x128xf32>
    %23 = arith.mulf %21, %22 : vector<1x128xf32>
    %c0_8 = arith.constant 0 : index
    %c0_9 = arith.constant 0 : index
    %c0_10 = arith.constant 0 : index
    %c0_11 = arith.constant 0 : index
    %24 = vector.load %arg7[%c0_8, %c0_9, %c0_10, %c0_11] : memref<1x1x8x128xf32, #tpu.memory_space<vmem>>, vector<1x1x1x128xf32>
    %25 = vector.shape_cast %24 : vector<1x1x1x128xf32> to vector<1x128xf32>
    %26 = vector.broadcast %7 : f32 to vector<1x128xf32>
    %27 = arith.mulf %25, %26 : vector<1x128xf32>
    %c1_i32_12 = arith.constant 1 : i32
    %28 = tpu.dynamic_rotate %19 by %c1_i32_12 dim 0 : vector<16x128xf32>, i32 -> vector<16x128xf32>
    %29 = vector.shape_cast %23 : vector<1x128xf32> to vector<1x128xf32>
    %30 = vector.broadcast %29 : vector<1x128xf32> to vector<16x128xf32>
    %31 = arith.select %11, %28, %30 : vector<16x128xi1>, vector<16x128xf32>
    %c15_i32_13 = arith.constant 15 : i32
    %32 = tpu.dynamic_rotate %19 by %c15_i32_13 dim 0 : vector<16x128xf32>, i32 -> vector<16x128xf32>
    %33 = vector.shape_cast %27 : vector<1x128xf32> to vector<1x128xf32>
    %34 = vector.broadcast %33 : vector<1x128xf32> to vector<16x128xf32>
    %35 = arith.select %13, %32, %34 : vector<16x128xi1>, vector<16x128xf32>
    %36 = arith.addf %19, %31 : vector<16x128xf32>
    %37 = arith.addf %36, %35 : vector<16x128xf32>
    %c1_i32_14 = arith.constant 1 : i32
    %38 = tpu.dynamic_rotate %37 by %c1_i32_14 dim 1 : vector<16x128xf32>, i32 -> vector<16x128xf32>
    %cst_15 = arith.constant 0.000000e+00 : f32
    %39 = vector.broadcast %cst_15 : f32 to vector<16x128xf32>
    %40 = arith.select %15, %38, %39 : vector<16x128xi1>, vector<16x128xf32>
    %c127_i32_16 = arith.constant 127 : i32
    %41 = tpu.dynamic_rotate %37 by %c127_i32_16 dim 1 : vector<16x128xf32>, i32 -> vector<16x128xf32>
    %cst_17 = arith.constant 0.000000e+00 : f32
    %42 = vector.broadcast %cst_17 : f32 to vector<16x128xf32>
    %43 = arith.select %17, %41, %42 : vector<16x128xi1>, vector<16x128xf32>
    %44 = arith.addf %37, %40 : vector<16x128xf32>
    %45 = arith.addf %44, %43 : vector<16x128xf32>
    %cst_18 = arith.constant 9.000000e+00 : f32
    %46 = vector.broadcast %cst_18 : f32 to vector<16x128xf32>
    %47 = arith.mulf %46, %19 : vector<16x128xf32>
    %48 = arith.subf %47, %45 : vector<16x128xf32>
    %49 = math.tanh %48 : vector<16x128xf32>
    %50 = math.absf %49 : vector<16x128xf32>
    %c0_19 = arith.constant 0 : index
    %c0_20 = arith.constant 0 : index
    %c0_21 = arith.constant 0 : index
    %c0_22 = arith.constant 0 : index
    %51 = vector.load %arg2[%c0_19, %c0_20, %c0_21, %c0_22] : memref<1x1x16x128xf32, #tpu.memory_space<vmem>>, vector<1x1x16x128xf32>
    %52 = vector.shape_cast %51 : vector<1x1x16x128xf32> to vector<16x128xf32>
    %c0_23 = arith.constant 0 : index
    %c0_24 = arith.constant 0 : index
    %c7_25 = arith.constant 7 : index
    %c0_26 = arith.constant 0 : index
    %53 = vector.load %arg3[%c0_23, %c0_24, %c7_25, %c0_26] : memref<1x1x8x128xf32, #tpu.memory_space<vmem>>, vector<1x1x1x128xf32>
    %54 = vector.shape_cast %53 : vector<1x1x1x128xf32> to vector<1x128xf32>
    %55 = vector.broadcast %3 : f32 to vector<1x128xf32>
    %56 = arith.mulf %54, %55 : vector<1x128xf32>
    %c0_27 = arith.constant 0 : index
    %c0_28 = arith.constant 0 : index
    %c0_29 = arith.constant 0 : index
    %c0_30 = arith.constant 0 : index
    %57 = vector.load %arg4[%c0_27, %c0_28, %c0_29, %c0_30] : memref<1x1x8x128xf32, #tpu.memory_space<vmem>>, vector<1x1x1x128xf32>
    %58 = vector.shape_cast %57 : vector<1x1x1x128xf32> to vector<1x128xf32>
    %59 = vector.broadcast %7 : f32 to vector<1x128xf32>
    %60 = arith.mulf %58, %59 : vector<1x128xf32>
    %c1_i32_31 = arith.constant 1 : i32
    %61 = tpu.dynamic_rotate %52 by %c1_i32_31 dim 0 : vector<16x128xf32>, i32 -> vector<16x128xf32>
    %62 = vector.shape_cast %56 : vector<1x128xf32> to vector<1x128xf32>
    %63 = vector.broadcast %62 : vector<1x128xf32> to vector<16x128xf32>
    %64 = arith.select %11, %61, %63 : vector<16x128xi1>, vector<16x128xf32>
    %c15_i32_32 = arith.constant 15 : i32
    %65 = tpu.dynamic_rotate %52 by %c15_i32_32 dim 0 : vector<16x128xf32>, i32 -> vector<16x128xf32>
    %66 = vector.shape_cast %60 : vector<1x128xf32> to vector<1x128xf32>
    %67 = vector.broadcast %66 : vector<1x128xf32> to vector<16x128xf32>
    %68 = arith.select %13, %65, %67 : vector<16x128xi1>, vector<16x128xf32>
    %69 = arith.addf %52, %64 : vector<16x128xf32>
    %70 = arith.addf %69, %68 : vector<16x128xf32>
    %c1_i32_33 = arith.constant 1 : i32
    %71 = tpu.dynamic_rotate %70 by %c1_i32_33 dim 1 : vector<16x128xf32>, i32 -> vector<16x128xf32>
    %cst_34 = arith.constant 0.000000e+00 : f32
    %72 = vector.broadcast %cst_34 : f32 to vector<16x128xf32>
    %73 = arith.select %15, %71, %72 : vector<16x128xi1>, vector<16x128xf32>
    %c127_i32_35 = arith.constant 127 : i32
    %74 = tpu.dynamic_rotate %70 by %c127_i32_35 dim 1 : vector<16x128xf32>, i32 -> vector<16x128xf32>
    %cst_36 = arith.constant 0.000000e+00 : f32
    %75 = vector.broadcast %cst_36 : f32 to vector<16x128xf32>
    %76 = arith.select %17, %74, %75 : vector<16x128xi1>, vector<16x128xf32>
    %77 = arith.addf %70, %73 : vector<16x128xf32>
    %78 = arith.addf %77, %76 : vector<16x128xf32>
    %cst_37 = arith.constant 9.000000e+00 : f32
    %79 = vector.broadcast %cst_37 : f32 to vector<16x128xf32>
    %80 = arith.mulf %79, %52 : vector<16x128xf32>
    %81 = arith.subf %80, %78 : vector<16x128xf32>
    %82 = math.tanh %81 : vector<16x128xf32>
    %83 = math.absf %82 : vector<16x128xf32>
    %cst_38 = arith.constant 1.000000e+00 : f32
    %84 = vector.broadcast %cst_38 : f32 to vector<16x128xf32>
    %85 = arith.subf %84, %50 : vector<16x128xf32>
    %86 = arith.mulf %85, %83 : vector<16x128xf32>
    %cst_39 = arith.constant 0.000000e+00 : f32
    %87 = vector.broadcast %cst_39 : f32 to vector<16x128xf32>
    %88 = arith.subf %87, %83 : vector<16x128xf32>
    %89 = math.exp %88 : vector<16x128xf32>
    %90 = math.log1p %89 : vector<16x128xf32>
    %91 = arith.addf %86, %90 : vector<16x128xf32>
    %92 = vector.extract_strided_slice %91 {offsets = [0, 0], sizes = [8, 128], strides = [1, 1]} : vector<16x128xf32> to vector<8x128xf32>
    %93 = vector.extract_strided_slice %91 {offsets = [8, 0], sizes = [8, 128], strides = [1, 1]} : vector<16x128xf32> to vector<8x128xf32>
    %94 = arith.addf %92, %93 : vector<8x128xf32>
    %c0_40 = arith.constant 0 : index
    %c0_41 = arith.constant 0 : index
    %c0_42 = arith.constant 0 : index
    %c0_43 = arith.constant 0 : index
    %95 = vector.load %arg8[%c0_40, %c0_41, %c0_42, %c0_43] : memref<1x1x8x128xf32, #tpu.memory_space<vmem>>, vector<1x1x8x128xf32>
    %96 = vector.shape_cast %95 : vector<1x1x8x128xf32> to vector<8x128xf32>
    %97 = vector.shape_cast %94 : vector<8x128xf32> to vector<1x1x8x128xf32>
    tpu.vector_store %arg8[%c0_40, %c0_41, %c0_42, %c0_43], %97 {strides = array<i32>} : memref<1x1x8x128xf32, #tpu.memory_space<vmem>>, vector<1x1x8x128xf32>,
    return
  }
  func.func @transform_0(%arg0: i32, %arg1: i32) -> (i32, i32, i32, i32) {
    %c0_i32 = arith.constant 0 : i32
    %c0_i32_0 = arith.constant 0 : i32
    %c0_i32_1 = arith.constant 0 : i32
    return %arg0, %c0_i32, %arg1, %c0_i32_0 : i32, i32, i32, i32
  }
  func.func @transform_1(%arg0: i32, %arg1: i32) -> (i32, i32, i32, i32) {
    %c2_i32 = arith.constant 2 : i32
    %0 = arith.muli %arg1, %c2_i32 : i32
    %c1_i32 = arith.constant 1 : i32
    %1 = arith.subi %0, %c1_i32 : i32
    %c0_i32 = arith.constant 0 : i32
    %2 = arith.maxsi %1, %c0_i32 : i32
    %c0_i32_0 = arith.constant 0 : i32
    %c0_i32_1 = arith.constant 0 : i32
    %c0_i32_2 = arith.constant 0 : i32
    return %arg0, %c0_i32_0, %2, %c0_i32_1 : i32, i32, i32, i32
  }
  func.func @transform_2(%arg0: i32, %arg1: i32) -> (i32, i32, i32, i32) {
    %c1_i32 = arith.constant 1 : i32
    %0 = arith.addi %arg1, %c1_i32 : i32
    %c2_i32 = arith.constant 2 : i32
    %1 = arith.muli %0, %c2_i32 : i32
    %c7_i32 = arith.constant 7 : i32
    %2 = arith.minsi %1, %c7_i32 : i32
    %c0_i32 = arith.constant 0 : i32
    %c0_i32_0 = arith.constant 0 : i32
    %c0_i32_1 = arith.constant 0 : i32
    return %arg0, %c0_i32, %2, %c0_i32_0 : i32, i32, i32, i32
  }
  func.func @transform_3(%arg0: i32, %arg1: i32) -> (i32, i32, i32, i32) {
    %c0_i32 = arith.constant 0 : i32
    %c0_i32_0 = arith.constant 0 : i32
    %c0_i32_1 = arith.constant 0 : i32
    return %arg0, %c0_i32, %arg1, %c0_i32_0 : i32, i32, i32, i32
  }
  func.func @transform_4(%arg0: i32, %arg1: i32) -> (i32, i32, i32, i32) {
    %c2_i32 = arith.constant 2 : i32
    %0 = arith.muli %arg1, %c2_i32 : i32
    %c1_i32 = arith.constant 1 : i32
    %1 = arith.subi %0, %c1_i32 : i32
    %c0_i32 = arith.constant 0 : i32
    %2 = arith.maxsi %1, %c0_i32 : i32
    %c0_i32_0 = arith.constant 0 : i32
    %c0_i32_1 = arith.constant 0 : i32
    %c0_i32_2 = arith.constant 0 : i32
    return %arg0, %c0_i32_0, %2, %c0_i32_1 : i32, i32, i32, i32
  }
  func.func @transform_5(%arg0: i32, %arg1: i32) -> (i32, i32, i32, i32) {
    %c1_i32 = arith.constant 1 : i32
    %0 = arith.addi %arg1, %c1_i32 : i32
    %c2_i32 = arith.constant 2 : i32
    %1 = arith.muli %0, %c2_i32 : i32
    %c7_i32 = arith.constant 7 : i32
    %2 = arith.minsi %1, %c7_i32 : i32
    %c0_i32 = arith.constant 0 : i32
    %c0_i32_0 = arith.constant 0 : i32
    %c0_i32_1 = arith.constant 0 : i32
    return %arg0, %c0_i32, %2, %c0_i32_0 : i32, i32, i32, i32
  }
  func.func @transform_6(%arg0: i32, %arg1: i32) -> (i32, i32, i32, i32) {
    %c0_i32 = arith.constant 0 : i32
    %c0_i32_0 = arith.constant 0 : i32
    %c0_i32_1 = arith.constant 0 : i32
    return %arg0, %arg1, %c0_i32, %c0_i32_0 : i32, i32, i32, i32
  }
}

</mosaic_0001>

<bundles_post_ra>
// kernel: tpu_custom_call.1
= control target key start
LH: loop header
LB: loop body
LE: loop exit
PB: predicated region body
PF: predicated region fallthrough
CT: control target
= control target key end

     0   :  { %s2209_s0 = inlined_call_operand.hbm [shape: f32[2,1,64,128], index: 0, kind: input, shape index: {}]   ;;  %s2210_s1 = inlined_call_operand.hbm [shape: f32[2,1,64,128], index: 1, kind: input, shape index: {}]   ;;  %s2211_s2 = inlined_call_operand.hbm [shape: f32[2,1,64,128], index: 2, kind: input, shape index: {}]   ;;  %s2212_s3 = inlined_call_operand.hbm [shape: f32[2,1,64,128], index: 3, kind: input, shape index: {}]   ;;  %s2213_s4 = inlined_call_operand.hbm [shape: f32[2,1,64,128], index: 4, kind: input, shape index: {}]   ;;  %s2214_s5 = inlined_call_operand.hbm [shape: f32[2,1,64,128], index: 5, kind: input, shape index: {}]   ;;  %s2215_s6 = inlined_call_operand.hbm [shape: f32[2,4,8,128], index: 6, kind: output, shape index: {}]  }
   0x1   :  { %2247 = sst [smem:[#allocation38_spill]] %s2210_s1 }
   0x2   :  { %2248 = sst [smem:[#allocation39_spill]] %s2211_s2 }
   0x3   :  { %2249 = sst [smem:[#allocation40_spill]] %s2212_s3 }
   0x4   :  { %2250 = sst [smem:[#allocation41_spill]] %s2213_s4 }
   0x5   :  { %2251 = sst [smem:[#allocation42_spill]] %s2214_s5 }
   0x6   :  { %2252 = sst [smem:[#allocation43_spill]] %s2215_s6 }
   0x7   :  { %11 = vsyncpa [#allocation3], 0 }
   0x8   :  { %13 = vsyncpa [#allocation3 + $0x1], 0 }
   0x9   :  { %14 = vsyncpa [#allocation6], 0 }
   0xa   :  { %16 = vsyncpa [#allocation6 + $0x1], 0 }
   0xb   :  { %17 = vsyncpa [#allocation9], 0 }
   0xc   :  { %19 = vsyncpa [#allocation9 + $0x1], 0 }
   0xd   :  { %20 = vsyncpa [#allocation12], 0 }
   0xe   :  { %22 = vsyncpa [#allocation12 + $0x1], 0 }
   0xf   :  { %23 = vsyncpa [#allocation4], 0 }
  0x10   :  { %25 = vsyncpa [#allocation4 + $0x1], 0  ;;  %s1573_s21 = smov 0   ;;  %s1575_s22 = smov 0  }
  0x11   :  { %s1577_s23 = smov 0   ;;  %s1579_s24 = smov 0  }
  0x12   :  { %s1581_s25 = smov 0   ;;  %s1583_s26 = smov 0  }
  0x13   :  { %s1585_s27 = smov 0   ;;  %s1587_s28 = smov 0  }
  0x14   :  { %s1589_s29 = smov 0   ;;  %s1591_s30 = smov 0  }
  0x15   :  { %s1593_s7 = smov 0   ;;  %s1595_s8 = smov 0  }
  0x16   :  { %s1597_s9 = smov 0   ;;  %s1599_s10 = smov 0  }
  0x17 LB: > { %2253 = sst [smem:[#allocation21_spill]] %s1489_s25  ;;  %s1644_s11 = sadd.s32 4294967295, %s1525_s10   ;;  %s1525_s10 = sphi %s1599_s10, %s31_s10   ;;  %s1521_s9 = sphi %s1597_s9, %s2330_s9   ;;  %s1517_s8 = sphi %s1595_s8, %s2329_s8   ;;  %s1513_s7 = sphi %s1593_s7, %s2328_s7   ;;  %s1509_s30 = sphi %s1591_s30, %s2327_s30   ;;  %s1505_s29 = sphi %s1589_s29, %s2336_s29   ;;  %s1501_s28 = sphi %s1587_s28, %s2335_s28   ;;  %s1497_s27 = sphi %s1585_s27, %s2325_s27   ;;  %s1493_s26 = sphi %s1583_s26, %s2324_s26   ;;  %s1489_s25 = sphi %s1581_s25, %s2323_s25   ;;  %s1485_s24 = sphi %s1579_s24, %s2322_s24   ;;  %s1481_s23 = sphi %s1577_s23, %s2334_s23   ;;  %s1477_s22 = sphi %s1575_s22, %s2333_s22   ;;  %s1473_s21 = sphi %s1573_s21, %s2332_s21  }
  0x18   : > { %2254 = sst [smem:[#allocation22_spill]] %s1493_s26  ;;  %s40_s12 = sadd.s32 1, %s1517_s8 }
  0x19   : > { %2255 = sst [smem:[#allocation23_spill]] %s1497_s27  ;;  %p41_p0 = scmp.ge.s32.totalorder %s40_s12, 4 }
  0x1a   : > { %2256 = sst [smem:[#allocation24_spill]] %s1501_s28  ;;  %s43_s13 = sadd.s32 1, %s1521_s9 }
  0x1b   : > { %2257 = sst [smem:[#allocation25_spill]] %s1509_s30  ;;  %p2229_p1 = scmp.eq.s32.totalorder %s1525_s10, 0 }
  0x1c   : > { %2258 = sst [smem:[#allocation26_spill]] %s1513_s7  ;;  %p2228_p2 = scmp.eq.s32.totalorder %s1644_s11, 0 }
  0x1d   : > { %2259 = sst [smem:[#allocation27_spill]] %s1517_s8  ;;  %s2338_s12 = smov (%p41_p0, %s40_s12), 0 }
  0x1e   : > { %2260 = sst [smem:[#allocation28_spill]] %s1521_s9  ;;  %s2340_s13 = smov (!%p41_p0, %s43_s13), %s1521_s9 }
  0x1f   : > { %2261 = sst [smem:[#allocation29_spill]] %s2338_s12  ;;  %s48_s14 = ssub.s32 %s1517_s8, %s2338_s12 }
  0x20   : > { %s1656_s15 = sshll.u32 %s1517_s8, 1  ;;  %p45_p3 = scmp.ge.s32.totalorder %s2340_s13, 2 }
  0x21   : > { %s944_s16 = sadd.s32 4294967295, %s1656_s15  ;;  %s945_s17 = sshll.u32 %s2338_s12, 1 }
  0x22   : > { %p77_p4 = scmp.gt.s32.totalorder %s944_s16, 0  ;;  %s2342_s13 = smov (%p45_p3, %s2340_s13), 0 }
  0x23   : > { %2262 = sst [smem:[#allocation30_spill]] %s2342_s13  ;;  %s1664_s18 = ssub.s32 %s1521_s9, %s2342_s13 }
  0x24   : > { %s2344_s16 = smov (!%p77_p4, %s944_s16), 0  ;;  %s946_s19 = sadd.s32 4294967295, %s945_s17 }
  0x25   : > { %s1667_s20 = sor.u32 %s48_s14, %s1664_s18  ;;  %p81_p5 = scmp.gt.s32.totalorder %s946_s19, 0 }
  0x26   : > { %s88_s12 = sadd.s32 1, %s1493_s26  ;;  %p95_p7 = scmp.ne.s32.totalorder %s1493_s26, %s1489_s25 }
  0x27   : > { %s2346_s19 = smov (!%p81_p5, %s946_s19), 0  ;;  %p101_p8 = scmp.ne.s32.totalorder %s1489_s25, %s1485_s24 }
  0x28   : > { %s84_s13 = ssub.s32 %s2344_s16, %s2346_s19  ;;  %s1675_s8 = sadd.s32 2, %s945_s17 }
  0x29   : > { %s85_s6 = sor.u32 %s84_s13, %s1664_s18  ;;  %p1680_p9 = por %p95_p7, %p2229_p1 }
  0x2a   : > { %p86_p10 = scmp.eq.s32.totalorder %s85_s6, 0  ;;  %p1686_p11 = por %p101_p8, %p2228_p2 }
  0x2b   : > { %p2227_p0 = scmp.lt.s32.totalorder %s1525_s10, 8  ;;  %s1697_s13 = sshll.u32 %s1521_s9, 3 }
  0x2c   : > { %s2264_s7 = scalar_select %p1686_p11, 1, 0 }
  0x2d   : > { %s1693_s24 = scalar_select %p86_p10, %s1493_s26, %s88_s12  }
  0x2e   : > { %2265 = sst [smem:[#allocation31_spill]] %s2264_s7  ;;  %s314_s6 = sand.u32 1, %s1493_s26  }
  0x2f   : > { %2266 = sst [smem:[#allocation32_spill]] %s1693_s24  ;;  %s325_s30 = sadd.s32 %s1697_s13, %s2344_s16 }
  0x30   : > { %s1704_s25 = sshll.u32 %s314_s6, 3  ;;  %s1706_s5 = sshll.u32 %s325_s30, 7 }
  0x31   : > { %s2267_s1 = sld [smem:[#allocation38_spill]]  ;;  %s316_s9 = scalar_lea.vmem [#allocation5], %s1704_s25 }
  0x32   : > { %s329_s17 = sshll.u32 %s316_s9, 4  ;;  %p1719_p3 = pnand %p2227_p0, %p1680_p9  ;;  %s1723_s17 = int_to_ptr.vmem [resolvable:$true] %s329_s17 }
  0x33   : > { %s2269_s30 = sand.u32 1, %s1525_s10  }
  0x34   : > { %s1727_s2 = scalar_lea.sflag [#allocation6], %s2269_s30  ;;  %p2230_p5 = pneg %p1719_p3 }
  0x37   : > { %s1712_s12 = scalar_lea.hbm %s2267_s1, %s1706_s5  ;;  %s1184_s6 = scalar_lea.hbm %s2267_s1, 2048 }
  0x38   : > { %s1179_s7 = scalar_lea.hbm %s1712_s12, 128  ;;  %p1185_p9 = scmp.lt.u32.totalorder %s1712_s12, %s2267_s1 }
  0x39   : > { %p1180_p4 = scmp.ne.s32.totalorder %s1712_s12, %s1179_s7  ;;  %p1186_p10 = scmp.lt.u32.totalorder %s1184_s6, %s1179_s7 }
  0x3a   : > { %p1188_p0 = scmp.lt.u32.totalorder %s1179_s7, %s1712_s12 }
  0x3b   : > { %p1182_p7 = pnand %p2230_p5, %p1180_p4  ;;  %p1187_p12 = por %p1186_p10, %p1185_p9 }
  0x3d   : > { %p1183_p8 = pneg %p1182_p7  ;;  %p1189_p13 = por %p1188_p0, %p1187_p12 }
  0x3f   : > { %p1190_p2 = pnand %p1189_p13, %p1183_p8 }
  0x41   : > { %1193 = shalt.err (!%p1190_p2)
}
  0x42   : > { %s1194_s30 = scalar_lea.vmem %s1723_s17, 128  ;;  %s1527_s9 = smov [#allocation5]  }
  0x43   : > { %p1195_p4 = scmp.ne.s32.totalorder %s1723_s17, %s1194_s30  ;;  %s1199_s14 = sshll.u32 %s1527_s9, 4  ;;  %s1200_s14 = int_to_ptr.vmem [resolvable:$false] %s1199_s14 }
  0x44   : > { %s1201_s24 = scalar_lea.vmem %s1200_s14, 256  ;;  %p1202_p6 = scmp.lt.s32.totalorder %s1723_s17, %s1200_s14 }
  0x45   : > { %p1197_p7 = pnand %p1195_p4, %p2230_p5  ;;  %p1203_p9 = scmp.lt.s32.totalorder %s1201_s24, %s1194_s30 }
  0x47   : > { %p1198_p1 = pneg %p1197_p7  ;;  %p1204_p10 = por %p1203_p9, %p1202_p6 }
  0x49   : > { %p1205_p12 = pnand %p1204_p10, %p1198_p1 }
  0x4b   : > { %1208 = shalt.err (!%p1205_p12)
}
  0x4c   : > { %1028 = dma.hbm_to_vmem [thread:$0]  (!%p1719_p3), %s1712_s12, 128, %s1723_s17, %s1727_s2  }
  0x4d   : > { %s2270_s4 = sld [smem:[#allocation41_spill]]  ;;  %p983_p1 = scmp.ge.s32.totalorder %s1525_s10, 1 }
  0x4e   : > { %p429_p2 = scmp.lt.s32.totalorder %s1525_s10, 9  ;;  %s942_s9 = sadd.s32 4294967294, %s1525_s10  }
  0x4f   : > { %s52_s14 = sadd.s32 1, %s1505_s29  ;;  %p2273_p13 = scmp.eq.s32.totalorder %s1667_s20, 0 }
  0x50   : > { %p1763_p6 = pnand %p983_p1, %p429_p2  ;;  %p59_p0 = scmp.ne.s32.totalorder %s1505_s29, %s1501_s28 }
  0x51   : > { %s1772_s24 = scalar_select %p2273_p13, %s1505_s29, %s52_s14  }
  0x52   : > { %s2271_s30 = scalar_select %p1763_p6, 1, 0 }
  0x53   : > { %s1759_s6 = scalar_lea.hbm %s2270_s4, %s1706_s5  ;;  %2274 = sst [smem:[#allocation34_spill]] %s1772_s24 }
  0x54   : > { %2272 = sst [smem:[#allocation33_spill]] %s2271_s30  ;;  %p65_p8 = scmp.ne.s32.totalorder %s1501_s28, %s1497_s27 }
  0x55   : > { %p269_p4 = scmp.eq.s32.totalorder %s942_s9, 7  ;;  %s2232_s5 = sand.u32 1, %s1505_s29  }
  0x56   : > { %p2275_p7 = scmp.eq.s32.totalorder %s1525_s10, 0  ;;  %p2276_p10 = scmp.eq.s32.totalorder %s1644_s11, 0 }
  0x57   : > { %p2279_p1 = scmp.eq.s32.totalorder %s1644_s11, 7  ;;  %p1793_p5 = por %p269_p4, %p65_p8 }
  0x58   : > { %p61_p9 = por %p2275_p7, %p59_p0  ;;  %p1783_p12 = por %p2276_p10, %p65_p8 }
  0x59   : > { %p1789_p2 = por %p2279_p1, %p59_p0  ;;  %s1799_s19 = sshll.u32 %s2232_s5, 4 }
  0x5a   : > { %s2277_s17 = scalar_select %p1783_p12, 1, 0 }
  0x5b   : > { %s2280_s12 = scalar_select %p1789_p2, 1, 0 }
  0x5c   : > { %2278 = sst [smem:[#allocation35_spill]] %s2277_s17  ;;  %s2284_s7 = sadd.s32 %s1697_s13, %s1656_s15 }
  0x5d   : > { %2281 = sst [smem:[#allocation36_spill]] %s2280_s12  ;;  %s1804_s9 = sshll.u32 %s2284_s7, 7 }
  0x5e   : > { %s2282_s20 = scalar_select %p1793_p5, 1, 0 }
  0x5f   : > { %p2285_p13 = scmp.lt.s32.totalorder %s1525_s10, 8  ;;  %s2287_s3 = sld [smem:[#allocation40_spill]] }
  0x60   : > { %2283 = sst [smem:[#allocation37_spill]] %s2282_s20  ;;  %s364_s5 = scalar_lea.vmem [#allocation8], %s1799_s19 }
  0x61   : > { %p1808_p7 = pnand %p2285_p13, %p61_p9  ;;  %s373_s7 = sshll.u32 %s364_s5, 4  ;;  %s1819_s7 = int_to_ptr.vmem [resolvable:$true] %s373_s7 }
  0x62   : > { %s2288_s20 = sand.u32 1, %s1525_s10  }
  0x63   : > { %s1823_s27 = scalar_lea.sflag [#allocation9], %s2288_s20  ;;  %p1211_p8 = pneg %p1808_p7 }
  0x65   : > { %s1816_s26 = scalar_lea.hbm %s2287_s3, %s1804_s9  ;;  %s1214_s17 = scalar_lea.hbm %s2287_s3, 2048 }
  0x66   : > { %s1209_s12 = scalar_lea.hbm %s1816_s26, 256  ;;  %p1215_p10 = scmp.lt.u32.totalorder %s1816_s26, %s2287_s3 }
  0x67   : > { %p1210_p0 = scmp.ne.s32.totalorder %s1816_s26, %s1209_s12  ;;  %p1216_p1 = scmp.lt.u32.totalorder %s1214_s17, %s1209_s12 }
  0x68   : > { %p1218_p5 = scmp.lt.u32.totalorder %s1209_s12, %s1816_s26 }
  0x69   : > { %p1212_p4 = pnand %p1211_p8, %p1210_p0  ;;  %p1217_p13 = por %p1216_p1, %p1215_p10 }
  0x6b   : > { %p1213_p9 = pneg %p1212_p4  ;;  %p1219_p2 = por %p1218_p5, %p1217_p13 }
  0x6d   : > { %p1220_p11 = pnand %p1219_p2, %p1213_p9 }
  0x6f   : > { %1223 = shalt.err (!%p1220_p11)
}
  0x70   : > { %s1224_s5 = scalar_lea.vmem %s1819_s7, 256  ;;  %s1528_s20 = smov [#allocation8]  }
  0x71   : > { %p1225_p0 = scmp.ne.s32.totalorder %s1819_s7, %s1224_s5  ;;  %s1229_s1 = sshll.u32 %s1528_s20, 4  ;;  %s1230_s1 = int_to_ptr.vmem [resolvable:$false] %s1229_s1 }
  0x72   : > { %s1231_s28 = scalar_lea.vmem %s1230_s1, 512  ;;  %p1232_p6 = scmp.lt.s32.totalorder %s1819_s7, %s1230_s1 }
  0x73   : > { %p1227_p4 = pnand %p1225_p0, %p1211_p8  ;;  %p1233_p10 = scmp.lt.s32.totalorder %s1231_s28, %s1224_s5 }
  0x75   : > { %p1228_p12 = pneg %p1227_p4  ;;  %p1234_p1 = por %p1233_p10, %p1232_p6 }
  0x77   : > { %p1235_p5 = pnand %p1234_p1, %p1228_p12 }
  0x79   : > { %1238 = shalt.err (!%p1235_p5)
}
  0x7a   : > { %s1529_s30 = smov 128   ;;  %s1530_s17 = smov 8  }
  0x7b   : > { %1034 = dma.hbm_to_vmem [thread:$0]  (!%p1808_p7), %s1816_s26, 256, %s1819_s7, %s1823_s27, %s1529_s30, %s1529_s30, %s1530_s17  }
  0x7c   : > { %s1858_s5 = scalar_lea.hbm %s2209_s0, %s1804_s9  ;;  %s293_s20 = scalar_lea.vmem [#allocation2], %s1799_s19 }
  0x7d   : > { %s302_s1 = sshll.u32 %s293_s20, 4  ;;  %s2289_s28 = sand.u32 1, %s1505_s29   ;;  %s1861_s1 = int_to_ptr.vmem [resolvable:$true] %s302_s1 }
  0x7e   : > { %s1865_s3 = scalar_lea.sflag [#allocation3], %s2289_s28  ;;  %s1239_s4 = scalar_lea.hbm %s1858_s5, 256 }
  0x7f   : > { %p1240_p11 = scmp.ne.s32.totalorder %s1858_s5, %s1239_s4  ;;  %s1244_s7 = scalar_lea.hbm %s2209_s0, 2048 }
  0x80   : > { %p1245_p2 = scmp.lt.u32.totalorder %s1858_s5, %s2209_s0  ;;  %p1246_p9 = scmp.lt.u32.totalorder %s1244_s7, %s1239_s4 }
  0x81   : > { %p1242_p6 = pnand %p1240_p11, %p1211_p8  ;;  %p1248_p0 = scmp.lt.u32.totalorder %s1239_s4, %s1858_s5 }
  0x82   : > { %p1247_p13 = por %p1246_p9, %p1245_p2 }
  0x83   : > { %p1243_p12 = pneg %p1242_p6 }
  0x84   : > { %p1249_p4 = por %p1248_p0, %p1247_p13 }
  0x86   : > { %p1250_p10 = pnand %p1249_p4, %p1243_p12 }
  0x88   : > { %1253 = shalt.err (!%p1250_p10)
}
  0x89   : > { %s1254_s19 = scalar_lea.vmem %s1861_s1, 256  ;;  %s1531_s20 = smov [#allocation2]  }
  0x8a   : > { %p1255_p1 = scmp.ne.s32.totalorder %s1861_s1, %s1254_s19  ;;  %s1259_s28 = sshll.u32 %s1531_s20, 4  ;;  %s1260_s28 = int_to_ptr.vmem [resolvable:$false] %s1259_s28 }
  0x8b   : > { %s1261_s26 = scalar_lea.vmem %s1260_s28, 512  ;;  %p1262_p6 = scmp.lt.s32.totalorder %s1861_s1, %s1260_s28 }
  0x8c   : > { %p1257_p5 = pnand %p1255_p1, %p1211_p8  ;;  %p1263_p2 = scmp.lt.s32.totalorder %s1261_s26, %s1254_s19 }
  0x8e   : > { %p1258_p11 = pneg %p1257_p5  ;;  %p1264_p9 = por %p1263_p2, %p1262_p6 }
  0x90   : > { %p1265_p13 = pnand %p1264_p9, %p1258_p11 }
  0x92   : > { %1268 = shalt.err (!%p1265_p13)
}
  0x93   : > { %1025 = dma.hbm_to_vmem [thread:$0]  (!%p1808_p7), %s1858_s5, 256, %s1861_s1, %s1865_s3, %s1529_s30, %s1529_s30, %s1530_s17  }
  0x94   : > { %s997_s4 = sadd.s32 2, %s1656_s15  ;;  %s124_s14 = sadd.s32 1, %s1481_s23 }
  0x95   : > { %p113_p8 = scmp.lt.s32.totalorder %s997_s4, 7  ;;  %p2290_p12 = scmp.lt.s32.totalorder %s1675_s8, 7 }
  0x96   : > { %p131_p0 = scmp.ne.s32.totalorder %s1481_s23, %s1477_s22  ;;  %p137_p4 = scmp.ne.s32.totalorder %s1477_s22, %s1473_s21 }
  0x97   : > { %s2348_s8 = smov (!%p2290_p12, %s1675_s8), 7  ;;  %s2350_s4 = smov (!%p113_p8, %s997_s4), 7 }
  0x98   : > { %s120_s9 = ssub.s32 %s2350_s4, %s2348_s8  ;;  %s338_s7 = sand.u32 1, %s1481_s23  }
  0x99   : > { %s121_s12 = sor.u32 %s120_s9, %s1664_s18  ;;  %p2291_p10 = scmp.eq.s32.totalorder %s1525_s10, 0 }
  0x9a   : > { %p122_p5 = scmp.eq.s32.totalorder %s121_s12, 0  ;;  %p2292_p11 = scmp.eq.s32.totalorder %s1644_s11, 0 }
  0x9b   : > { %p133_p1 = por %p131_p0, %p2291_p10  ;;  %s1915_s15 = sshll.u32 %s338_s7, 3 }
  0x9c   : > { %p1909_p6 = por %p137_p4, %p2292_p11  ;;  %s349_s30 = sadd.s32 %s1697_s13, %s2350_s4 }
  0x9d   : > { %s1919_s17 = scalar_select %p122_p5, %s1481_s23, %s124_s14  }
  0x9e   : > { %s2293_s3 = scalar_select %p1909_p6, 1, 0 }
  0x9f   : > { %s1921_s21 = sshll.u32 %s349_s30, 7  ;;  %s2294_s5 = sld [smem:[#allocation39_spill]] }
  0xa0   : > { %s340_s24 = scalar_lea.vmem [#allocation7], %s1915_s15  ;;  %p2295_p7 = scmp.lt.s32.totalorder %s1525_s10, 8 }
  0xa1   : > { %s353_s19 = sshll.u32 %s340_s24, 4  ;;  %s387_s20 = scalar_lea.vmem [#allocation10], %s1704_s25  ;;  %s1930_s19 = int_to_ptr.vmem [resolvable:$true] %s353_s19 }
  0xa2   : > { %p1934_p2 = pnand %p2295_p7, %p133_p1  ;;  %s400_s28 = sshll.u32 %s387_s20, 4  ;;  %s1939_s28 = int_to_ptr.vmem [resolvable:$true] %s400_s28 }
  0xa4   : > { %p2246_p13 = pneg %p1934_p2 }
  0xa5   : > { %s1927_s1 = scalar_lea.hbm %s2294_s5, %s1921_s21  ;;  %s1274_s9 = scalar_lea.hbm %s2294_s5, 2048 }
  0xa6   : > { %s1269_s26 = scalar_lea.hbm %s1927_s1, 128  ;;  %p1275_p0 = scmp.lt.u32.totalorder %s1927_s1, %s2294_s5 }
  0xa7   : > { %p1270_p9 = scmp.ne.s32.totalorder %s1927_s1, %s1269_s26  ;;  %p1276_p4 = scmp.lt.u32.totalorder %s1274_s9, %s1269_s26 }
  0xa8   : > { %p1278_p1 = scmp.lt.u32.totalorder %s1269_s26, %s1927_s1 }
  0xa9   : > { %p1272_p8 = pnand %p2246_p13, %p1270_p9  ;;  %p1277_p10 = por %p1276_p4, %p1275_p0 }
  0xab   : > { %p1273_p12 = pneg %p1272_p8  ;;  %p1279_p5 = por %p1278_p1, %p1277_p10 }
  0xad   : > { %p1280_p11 = pnand %p1279_p5, %p1273_p12 }
  0xaf   : > { %1283 = shalt.err (!%p1280_p11)
}
  0xb0   : > { %s1284_s25 = scalar_lea.vmem %s1930_s19, 128  ;;  %s1532_s8 = smov [#allocation7]  }
  0xb1   : > { %p1285_p7 = scmp.ne.s32.totalorder %s1930_s19, %s1284_s25  ;;  %s1289_s18 = sshll.u32 %s1532_s8, 4  ;;  %s1290_s18 = int_to_ptr.vmem [resolvable:$false] %s1289_s18 }
  0xb2   : > { %s1291_s24 = scalar_lea.vmem %s1290_s18, 256  ;;  %p1292_p6 = scmp.lt.s32.totalorder %s1930_s19, %s1290_s18 }
  0xb3   : > { %p1287_p9 = pnand %p1285_p7, %p2246_p13  ;;  %p1293_p0 = scmp.lt.s32.totalorder %s1291_s24, %s1284_s25 }
  0xb5   : > { %p1288_p8 = pneg %p1287_p9  ;;  %p1294_p4 = por %p1293_p0, %p1292_p6 }
  0xb7   : > { %p1295_p10 = pnand %p1294_p4, %p1288_p8 }
  0xb9   : > { %1298 = shalt.err (!%p1295_p10)
}
  0xba   : > { %1031 = dma.hbm_to_vmem [thread:$0]  (!%p1934_p2), %s1927_s1, 128, %s1930_s19, %s1727_s2  }
  0xbb   : > { %s1299_s20 = scalar_lea.hbm %s1759_s6, 128  ;;  %p2297_p1 = pneg %p1719_p3 }
  0xbc   : > { %p1300_p12 = scmp.ne.s32.totalorder %s1759_s6, %s1299_s20  ;;  %s2298_s14 = sld [smem:[#allocation41_spill]] }
  0xbd   : > { %p1308_p8 = scmp.lt.u32.totalorder %s1299_s20, %s1759_s6 }
  0xbe   : > { %p1302_p5 = pnand %p1300_p12, %p2297_p1 }
  0xc0   : > { %p1303_p11 = pneg %p1302_p5 }
  0xc2   : > { %s1304_s9 = scalar_lea.hbm %s2298_s14, 2048  ;;  %p1305_p6 = scmp.lt.u32.totalorder %s1759_s6, %s2298_s14 }
  0xc3   : > { %p1306_p7 = scmp.lt.u32.totalorder %s1304_s9, %s1299_s20 }
  0xc5   : > { %p1307_p9 = por %p1306_p7, %p1305_p6 }
  0xc7   : > { %p1309_p0 = por %p1308_p8, %p1307_p9 }
  0xc9   : > { %p1310_p4 = pnand %p1309_p0, %p1303_p11 }
  0xcb   : > { %1313 = shalt.err (!%p1310_p4)
}
  0xcc   : > { %s1314_s2 = scalar_lea.vmem %s1939_s28, 128  ;;  %p2299_p12 = pmov %p2297_p1 }
  0xcd   : > { %p1315_p10 = scmp.ne.s32.totalorder %s1939_s28, %s1314_s2  ;;  %s1533_s1 = smov [#allocation10]  }
  0xce   : > { %s1319_s19 = sshll.u32 %s1533_s1, 4  ;;  %s1320_s19 = int_to_ptr.vmem [resolvable:$false] %s1319_s19 }
  0xcf   : > { %p1317_p1 = pnand %p1315_p10, %p2299_p12  ;;  %s1321_s25 = scalar_lea.vmem %s1320_s19, 256 }
  0xd0   : > { %p1322_p13 = scmp.lt.s32.totalorder %s1939_s28, %s1320_s19  ;;  %p1323_p6 = scmp.lt.s32.totalorder %s1321_s25, %s1314_s2 }
  0xd1   : > { %p1318_p5 = pneg %p1317_p1 }
  0xd2   : > { %p1324_p7 = por %p1323_p6, %p1322_p13 }
  0xd4   : > { %p1325_p9 = pnand %p1324_p7, %p1318_p5 }
  0xd6   : > { %1328 = shalt.err (!%p1325_p9)
}
  0xd7   : > { %1037 = dma.hbm_to_vmem [thread:$0]  (!%p1719_p3), %s1759_s6, 128, %s1939_s28, %s1823_s27  }
  0xd8   : > { %s2300_s24 = sld [smem:[#allocation42_spill]]  ;;  %s411_s4 = scalar_lea.vmem [#allocation11], %s1915_s15 }
  0xd9   : > { %s424_s14 = sshll.u32 %s411_s4, 4  ;;  %s408_s16 = scalar_lea.sflag [#allocation12], %s338_s7  ;;  %s425_s14 = int_to_ptr.vmem [resolvable:$true] %s424_s14 }
  0xda   : > { %p2302_p11 = pneg %p1934_p2 }
  0xde   : > { %s2301_s20 = smov %s2300_s24  ;;  %s1995_s26 = scalar_lea.hbm %s2300_s24, %s1921_s21 }
  0xdf   : > { %s1329_s9 = scalar_lea.hbm %s1995_s26, 128  ;;  %s1334_s21 = scalar_lea.hbm %s2301_s20, 2048 }
  0xe0   : > { %p1330_p13 = scmp.ne.s32.totalorder %s1995_s26, %s1329_s9  ;;  %p1335_p0 = scmp.lt.u32.totalorder %s1995_s26, %s2301_s20 }
  0xe1   : > { %p1336_p4 = scmp.lt.u32.totalorder %s1334_s21, %s1329_s9  ;;  %p1338_p12 = scmp.lt.u32.totalorder %s1329_s9, %s1995_s26 }
  0xe2   : > { %p1332_p8 = pnand %p1330_p13, %p2302_p11 }
  0xe3   : > { %p1337_p10 = por %p1336_p4, %p1335_p0 }
  0xe4   : > { %p1333_p3 = pneg %p1332_p8 }
  0xe5   : > { %p1339_p1 = por %p1338_p12, %p1337_p10 }
  0xe7   : > { %p1340_p5 = pnand %p1339_p1, %p1333_p3 }
  0xe9   : > { %1343 = shalt.err (!%p1340_p5)
}
  0xea   : > { %s1344_s7 = scalar_lea.vmem %s425_s14, 128  ;;  %p2303_p7 = pmov %p2302_p11 }
  0xeb   : > { %p1345_p6 = scmp.ne.s32.totalorder %s425_s14, %s1344_s7  ;;  %s1534_s15 = smov [#allocation11]  }
  0xec   : > { %s1349_s30 = sshll.u32 %s1534_s15, 4  ;;  %s1350_s30 = int_to_ptr.vmem [resolvable:$false] %s1349_s30 }
  0xed   : > { %p1347_p9 = pnand %p1345_p6, %p2303_p7  ;;  %s1351_s2 = scalar_lea.vmem %s1350_s30, 256 }
  0xee   : > { %p1352_p11 = scmp.lt.s32.totalorder %s425_s14, %s1350_s30  ;;  %p1353_p8 = scmp.lt.s32.totalorder %s1351_s2, %s1344_s7 }
  0xef   : > { %p1348_p13 = pneg %p1347_p9 }
  0xf0   : > { %p1354_p0 = por %p1353_p8, %p1352_p11 }
  0xf2   : > { %p1355_p4 = pnand %p1354_p0, %p1348_p13 }
  0xf4   : > { %1358 = shalt.err (!%p1355_p4)
}
  0xf5   : > { %1040 = dma.hbm_to_vmem [thread:$0]  (!%p1934_p2), %s1995_s26, 128, %s425_s14, %s408_s16  }
  0xf6   : > { %s2304_s1 = sld [smem:[#allocation33_spill]] }
  0xfc   : > { %p2305_p3 = scmp.ne.s32.totalorder %s2304_s1, 0 }
  0xfd   : > { %s2306_s19 = sld [smem:[#allocation24_spill]] (!%p2305_p3)  ;;  %s2307_s25 = sld [smem:[#allocation35_spill]] (!%p2305_p3) }
  0xfe   : > { %433 = sbr.rel (%p2305_p3) target bundleno = 495 (0x1ef), region = 44 }
 0x103   : > { %s2022_s8 = sand.u32 (!%p2305_p3), 1, %s2306_s19   ;;  %p2308_p10 = scmp.ne.s32.totalorder (!%p2305_p3), %s2307_s25, 0 }
 0x104   : > { %s984_s18 = sshll.u32 (!%p2305_p3), %s2022_s8, 4  ;;  %s436_s24 = scalar_lea.sflag (!%p2305_p3), [#allocation3], %s2022_s8 }
 0x105   : > { %s2026_s4 = scalar_lea.vmem [#allocation2], %s984_s18 }
 0x106   : > { %1444 = dma.done.wait (%p2308_p10), %s436_s24, 256  }
 0x107   : > { %1446 = vsyncadd (%p2308_p10), %s436_s24, 4294967040  ;;  %s2309_s13 = sld [smem:[#allocation21_spill]]  ;;  %s2310_s26 = sld [smem:[#allocation31_spill]] }
 0x108   : > { %s444_s14 = sand.u32 1, %s1644_s11  }
 0x109   : > { %s445_s27 = scalar_lea.sflag [#allocation6], %s444_s14 }
 0x10d   : > { %s446_s16 = sand.u32 1, %s2309_s13   ;;  %p2311_p2 = scmp.ne.s32.totalorder %s2310_s26, 0 }
 0x10e   : > { %s2034_s9 = sshll.u32 %s446_s16, 3 }
 0x10f   : > { %s448_s6 = scalar_lea.vmem [#allocation5], %s2034_s9 }
 0x110   : > { %1448 = dma.done.wait (%p2311_p2), %s445_s27, 128  }
 0x111   : > { %1450 = vsyncadd (%p2311_p2), %s445_s27, 4294967168  ;;  %s455_s21 = sand.u32 1, %s1477_s22   ;;  %p2312_p12 = scmp.ne.s32.totalorder %s2293_s3, 0 }
 0x112   : > { %s2042_s28 = sshll.u32 %s455_s21, 3 }
 0x113   : > { %s457_s12 = scalar_lea.vmem [#allocation7], %s2042_s28 }
 0x114   : > { %1452 = dma.done.wait (%p2312_p12), %s445_s27, 128  }
 0x115   : > { %1454 = vsyncadd (%p2312_p12), %s445_s27, 4294967168  ;;  %s463_s11 = scalar_lea.sflag [#allocation9], %s444_s14  ;;  %s2049_s7 = scalar_lea.vmem [#allocation8], %s984_s18 }
 0x116   : > { %1456 = dma.done.wait (%p2308_p10), %s463_s11, 256  }
 0x117   : > { %1458 = vsyncadd (%p2308_p10), %s463_s11, 4294967040  ;;  %s475_s15 = scalar_lea.vmem [#allocation10], %s2034_s9 }
 0x118   : > { %1460 = dma.done.wait (%p2311_p2), %s463_s11, 128  }
 0x119   : > { %1462 = vsyncadd (%p2311_p2), %s463_s11, 4294967168  ;;  %s481_s30 = scalar_lea.sflag [#allocation12], %s455_s21  ;;  %s484_s2 = scalar_lea.vmem [#allocation11], %s2042_s28 }
 0x11a   : > { %1464 = dma.done.wait (%p2312_p12), %s481_s30, 128  }
 0x11b   : > { %1466 = vsyncadd (%p2312_p12), %s481_s30, 4294967168  ;;  %s2313_s1 = sld [smem:[#allocation25_spill]]  ;;  %v564_v0 = vlaneseq  ;;  %v2069_v3 = vld [vmem:[%s2026_s4] sm:$0xff]  ;;  %v2072_v4 = vld [vmem:[%s2026_s4 + $0x8] sm:$0xff]  ;;  %s1535_s4 = smov 127  }
 0x11c   : > { %v635_v5 = vld [vmem:[%s448_s6 + $0x7] sm:$0x1]  ;;  %v639_v8 = vrot.slane %v2069_v3, 7  ;;  %v640_v9 = vrot.slane %v2072_v4, 7  ;;  %v637_v10 = vld [vmem:[%s457_s12] sm:$0x1] }
 0x11d   : > { %v565_v1 = vshrl.u32 %v564_v0, 7  ;;  %v2081_v11 = vld [vmem:[%s2049_s7] sm:$0xff]  ;;  %v649_v13 = vrot.slane %v2069_v3, 1  ;;  %v650_v14 = vrot.slane %v2072_v4, 1  ;;  %v2086_v16 = vld [vmem:[%s2049_s7 + $0x8] sm:$0xff]  ;;  %s1536_s26 = smov 1  }
 0x11e   : > { %v577_v17 = vld [vmem:[%s475_s15 + $0x7] sm:$0x1]  ;;  %v583_v21 = vrot.slane %v2081_v11, 7  ;;  %v580_v22 = vld [vmem:[%s484_s2] sm:$0x1]  ;;  %v584_v27 = vrot.slane %v2086_v16, 7 }
 0x11f   : > { %vm569_vm0 = vcmp.ge.s32.totalorder %v565_v1, 1  ;;  %vm585_vm1 = vcmp.lt.s32.totalorder %v565_v1, 1  ;;  %v590_v2 = vsub.s32 0, %v565_v1  ;;  %v566_v6 = vadd.s32 8, %v565_v1  ;;  %s2314_s14 = sld [smem:[#allocation26_spill]]  ;;  %s990_s16 = sshll.u32 %s2022_s8, 3 }
 0x120   : > { %vm596_vm2 = vcmp.lt.s32.totalorder %v565_v1, 7  ;;  %v642_v18 = vsel %vm585_vm1, %v640_v9, %v639_v8  ;;  %v641_v24 = vsel %vm585_vm1, %v639_v8, %v640_v9  ;;  %v594_v29 = vrot.slane %v2081_v11, 1  ;;  %s2315_s6 = sld [smem:[#allocation36_spill]]  ;;  %s537_s28 = scalar_lea.vmem [#allocation13], %s990_s16 }
 0x121   : > { %p556_p1 = scmp.eq.s32.totalorder %s2313_s1, 0  ;;  %p560_p5 = scmp.eq.s32.totalorder %s2313_s1, 3  ;;  %vm572_vm3 = vcmp.lt.s32.totalorder %v566_v6, 15  ;;  %v652_v25 = vsel %vm596_vm2, %v650_v14, %v649_v13  ;;  %v651_v31 = vsel %vm596_vm2, %v649_v13, %v650_v14  ;;  %v595_v32 = vrot.slane %v2086_v16, 1 }
 0x122   : > { %v660_v35 = vadd.f32 %v641_v24, %v2072_v4  ;;  %v587_v36 = vsel %vm585_vm1, %v584_v27, %v583_v21  ;;  %v586_v39 = vsel %vm585_vm1, %v583_v21, %v584_v27  ;;  %v568_v50 = vand.u32 127, %v564_v0  ;;  %s735_s12 = sshll.u32 %s537_s28, 4  ;;  %s2316_s15 = sld [smem:[#allocation43_spill]]  ;;  %s2133_s12 = int_to_ptr.vmem [resolvable:$true] %s735_s12 }
 0x123   : > { %s557_s19 = scalar_select %p556_p1, 1, 0  ;;  %v598_v41 = vsel %vm596_vm2, %v595_v32, %v594_v29  ;;  %v606_v45 = vadd.f32 %v586_v39, %v2086_v16  ;;  %v597_v46 = vsel %vm596_vm2, %v594_v29, %v595_v32  ;;  %v679_v55 = vmul.f32 9.0, %v2069_v3 }
 0x124   : > { %s561_s25 = scalar_select %p560_p5, 1, 0  ;;  %vm574_vm4 = vcmp.lt.s32.totalorder %v568_v50, 127  ;;  %vm573_vm5 = vcmp.ge.s32.totalorder %v568_v50, 1  ;;  %v680_v63 = vmul.f32 9.0, %v2072_v4  ;;  %v626_v13 = vmul.f32 9.0, %v2086_v16 }
 0x125   : > { %s558_s18 = scvt.s32.f32 %s557_s19  ;;  %s992_s9 = sshll.u32 %s2314_s14, 2 }
 0x126   : > { %s562_s24 = scvt.s32.f32 %s561_s25  ;;  %s731_s27 = sadd.s32 %s2313_s1, %s992_s9 }
 0x127   : > { %s559_s13 = ssub.f32 1.0, %s558_s18  ;;  %s993_s21 = sshll.u32 %s731_s27, 7 }
 0x128   : > { %s563_s3 = ssub.f32 1.0, %s562_s24  ;;  %s2131_s30 = scalar_lea.hbm %s2316_s15, %s993_s21 }
 0x129   : > { %v578_v7 = vstv %s559_s13  ;;  %s720_s2 = scalar_lea.sflag [#allocation4], %s2022_s8  ;;  %s1359_s1 = scalar_lea.vmem %s2133_s12, 128 }
 0x12a   : > { %v636_v12 = vmul.f32 %v635_v5, %v578_v7  ;;  %v581_v15 = vstv %s563_s3  ;;  %v579_v20 = vmul.f32 %v578_v7, %v577_v17  ;;  %p1360_p6 = scmp.ne.s32.totalorder %s2133_s12, %s1359_s1  ;;  %p2317_p7 = scmp.ne.s32.totalorder %s2315_s6, 0 }
 0x12b   : > { %v638_v19 = vmul.f32 %v637_v10, %v581_v15  ;;  %v582_v33 = vmul.f32 %v581_v15, %v580_v22  ;;  %v625_v10 = vmul.f32 9.0, %v2081_v11  ;;  %s1537_s19 = smov [#allocation13]  }
 0x12c   : > { %v646_v23 = vrot.slane %v636_v12, %v590_v2  ;;  %v591_v28 = vrot.slane %v579_v20, %v590_v2  ;;  %p1361_p9 = pnand %p1360_p6, %p2317_p7  ;;  %s1363_s25 = sshll.u32 %s1537_s19, 4  ;;  %s1364_s25 = int_to_ptr.vmem [resolvable:$false] %s1363_s25 }
 0x12d   : > { %v656_v26 = vrot.slane %v638_v19, %v590_v2  ;;  %v602_v42 = vrot.slane %v582_v33, %v590_v2  ;;  %s1365_s18 = scalar_lea.vmem %s1364_s25, 256  ;;  %p1366_p11 = scmp.lt.s32.totalorder %s2133_s12, %s1364_s25 }
 0x12e   : > { %v647_v30 = vsel %vm569_vm0, %v642_v18, %v646_v23  ;;  %v592_v38 = vsel %vm569_vm0, %v587_v36, %v591_v28  ;;  %p1362_p13 = pneg %p1361_p9  ;;  %p1367_p8 = scmp.lt.s32.totalorder %s1365_s18, %s1359_s1 }
 0x12f   : > { %v659_v34 = vadd.f32 %v647_v30, %v2069_v3  ;;  %v658_v37 = vsel %vm572_vm3, %v652_v25, %v656_v26  ;;  %v605_v44 = vadd.f32 %v592_v38, %v2081_v11  ;;  %v604_v47 = vsel %vm572_vm3, %v598_v41, %v602_v42 }
 0x130   : > { %v662_v43 = vadd.f32 %v660_v35, %v658_v37  ;;  %v608_v49 = vadd.f32 %v606_v45, %v604_v47  ;;  %p1368_p0 = por %p1367_p8, %p1366_p11 }
 0x131   : > { %v661_v40 = vadd.f32 %v659_v34, %v651_v31  ;;  %v607_v48 = vadd.f32 %v605_v44, %v597_v46 }
 0x132   : > { %p1369_p4 = pnand %p1368_p0, %p1362_p13 }
 0x133   : > { %669 = vrot.lane.b32.xlu1 %v661_v40, %s1535_s4  ;;  %663 = vrot.lane.b32.xlu0 %v661_v40, %s1536_s26 }
 0x137   : > { %671 = vrot.lane.b32.xlu1 %v662_v43, %s1535_s4  ;;  %665 = vrot.lane.b32.xlu0 %v662_v43, %s1536_s26 }
 0x13b   : > { %609 = vrot.lane.b32.xlu0 %v607_v48, %s1536_s26  ;;  %611 = vrot.lane.b32.xlu1 %v608_v49, %s1536_s26 }
 0x13f   : > { %615 = vrot.lane.b32.xlu0 %v607_v48, %s1535_s4  ;;  %617 = vrot.lane.b32.xlu1 %v608_v49, %s1535_s4 }
 0x1a5   : > { %v670_v51 = vpop.permute.xlu1 %669  ;;  %v664_v52 = vpop.permute.xlu0 %663 }
 0x1a6   : > { %v673_v53 = vsel %vm574_vm4, %v670_v51, 0.0  ;;  %v667_v54 = vsel %vm573_vm5, %v664_v52, 0.0 }
 0x1a7   : > { %v675_v56 = vadd.f32 %v667_v54, %v661_v40 }
 0x1a9   : > { %v677_v57 = vadd.f32 %v675_v56, %v673_v53  ;;  %v672_v58 = vpop.permute.xlu1 %671  ;;  %v666_v59 = vpop.permute.xlu0 %665 }
 0x1aa   : > { %v674_v60 = vsel %vm574_vm4, %v672_v58, 0.0  ;;  %v668_v61 = vsel %vm573_vm5, %v666_v59, 0.0 }
 0x1ab   : > { %v681_v62 = vsub.f32 %v679_v55, %v677_v57  ;;  %v676_v0 = vadd.f32 %v668_v61, %v662_v43 }
 0x1ad   : > { %1163 = vtanh.f32 %v681_v62  ;;  %v678_v1 = vadd.f32 %v676_v0, %v674_v60  ;;  %v610_v2 = vpop.permute.xlu0 %609  ;;  %v612_v5 = vpop.permute.xlu1 %611 }
 0x1ae   : > { %v613_v6 = vsel %vm573_vm5, %v610_v2, 0.0  ;;  %v614_v3 = vsel %vm573_vm5, %v612_v5, 0.0 }
 0x1af   : > { %v682_v7 = vsub.f32 %v680_v63, %v678_v1  ;;  %v621_v8 = vadd.f32 %v613_v6, %v607_v48  ;;  %v622_v9 = vadd.f32 %v614_v3, %v608_v49 }
 0x1b1   : > { %1165 = vtanh.f32 %v682_v7  ;;  %v616_v12 = vpop.permute.xlu0 %615  ;;  %v618_v14 = vpop.permute.xlu1 %617 }
 0x1b2   : > { %v619_v4 = vsel %vm574_vm4, %v616_v12, 0.0  ;;  %v620_v15 = vsel %vm574_vm4, %v618_v14, 0.0 }
 0x1b3   : > { %v623_v17 = vadd.f32 %v621_v8, %v619_v4  ;;  %v624_v18 = vadd.f32 %v622_v9, %v620_v15 }
 0x1b5   : > { %v627_v19 = vsub.f32 %v625_v10, %v623_v17  ;;  %v628_v20 = vsub.f32 %v626_v13, %v624_v18 }
 0x1b7   : > { %v1164_v21 = vpop.eup %1163  ;;  %1167 = vtanh.f32 %v627_v19 }
 0x1b8   : > { %v685_v22 = vand.u32 2147483647, %v1164_v21  ;;  %1169 = vtanh.f32 %v628_v20 }
 0x1ba   : > { %v691_v23 = vsub.f32 0.0, %v685_v22 }
 0x1bb   : > { %v1166_v24 = vpop.eup %1165 }
 0x1bc   : > { %v693_v25 = vmul.f32 1.442695, %v691_v23  ;;  %v686_v11 = vand.u32 2147483647, %v1166_v24 }
 0x1be   : > { %1171 = vpow2.f32 %v693_v25  ;;  %v692_v26 = vsub.f32 0.0, %v686_v11 }
 0x1c0   : > { %v695_v16 = vmul.f32 1.442695, %v692_v26 }
 0x1c1   : > { %v1168_v27 = vpop.eup %1167 }
 0x1c2   : > { %v1170_v28 = vpop.eup %1169  ;;  %1173 = vpow2.f32 %v695_v16  ;;  %v631_v29 = vand.u32 2147483647, %v1168_v27 }
 0x1c3   : > { %v632_v30 = vand.u32 2147483647, %v1170_v28 }
 0x1c4   : > { %v687_v31 = vsub.f32 1.0, %v631_v29 }
 0x1c5   : > { %v688_v32 = vsub.f32 1.0, %v632_v30 }
 0x1c6   : > { %v689_v33 = vmul.f32 %v687_v31, %v685_v22 }
 0x1c7   : > { %v690_v34 = vmul.f32 %v688_v32, %v686_v11 }
 0x1c8   : > { %v1172_v35 = vpop.eup %1171 }
 0x1c9   : > { %v697_v36 = vadd.f32 1.0, %v1172_v35  ;;  %v700_v39 = vmul.f32 -0.5, %v1172_v35  ;;  %v703_v42 = vand.u32 2147483647, %v1172_v35 }
 0x1cb   : > { %1175 = vlog2.f32 %v697_v36  ;;  %v701_v40 = vadd.f32 1.0, %v700_v39  ;;  %vm704_vm6 = vcmp.lt.f32.partialorder %v703_v42, 0.0004427343 }
 0x1cc   : > { %v1174_v37 = vpop.eup %1173 }
 0x1cd   : > { %v706_v38 = vadd.f32 1.0, %v1174_v37  ;;  %v709_v41 = vmul.f32 -0.5, %v1174_v37  ;;  %v702_v45 = vmul.f32 %v1172_v35, %v701_v40  ;;  %v712_v47 = vand.u32 2147483647, %v1174_v37 }
 0x1cf   : > { %1177 = vlog2.f32 %v706_v38  ;;  %v710_v46 = vadd.f32 1.0, %v709_v41  ;;  %vm713_vm7 = vcmp.lt.f32.partialorder %v712_v47, 0.0004427343 }
 0x1d1   : > { %v711_v52 = vmul.f32 %v1174_v37, %v710_v46 }
 0x1d5   : > { %v1176_v43 = vpop.eup %1175 }
 0x1d6   : > { %v699_v44 = vmul.f32 0.6931472, %v1176_v43 }
 0x1d8   : > { %v705_v48 = vsel %vm704_vm6, %v702_v45, %v699_v44 }
 0x1d9   : > { %v1178_v49 = vpop.eup %1177  ;;  %v715_v50 = vadd.f32 %v705_v48, %v689_v33 }
 0x1da   : > { %v708_v51 = vmul.f32 0.6931472, %v1178_v49 }
 0x1dc   : > { %v714_v53 = vsel %vm713_vm7, %v711_v52, %v708_v51 }
 0x1dd   : > { %v716_v54 = vadd.f32 %v714_v53, %v690_v34 }
 0x1df   : > { %v717_v55 = vadd.f32 %v716_v54, %v715_v50 }
 0x1e1   : > { %718 = vst [vmem:[%s537_s28] sm:$0xff] %v717_v55 }
 0x1e2   : > { %1372 = shalt.err (!%p1369_p4)
}
 0x1e3   : > { %s1373_s8 = scalar_lea.hbm %s2131_s30, 128  ;;  %s1377_s3 = scalar_lea.hbm %s2316_s15, 1024 }
 0x1e4   : > { %p1374_p3 = scmp.ne.s32.totalorder %s2131_s30, %s1373_s8  ;;  %p1378_p12 = scmp.lt.u32.totalorder %s2131_s30, %s2316_s15 }
 0x1e5   : > { %p1379_p1 = scmp.lt.u32.totalorder %s1377_s3, %s1373_s8  ;;  %p1381_p6 = scmp.lt.u32.totalorder %s1373_s8, %s2131_s30 }
 0x1e6   : > { %p1375_p10 = pnand %p1374_p3, %p2317_p7 }
 0x1e7   : > { %p1380_p5 = por %p1379_p1, %p1378_p12 }
 0x1e8   : > { %p1376_p2 = pneg %p1375_p10 }
 0x1e9   : > { %p1382_p9 = por %p1381_p6, %p1380_p5 }
 0x1eb   : > { %p1383_p13 = pnand %p1382_p9, %p1376_p2 }
 0x1ed   : > { %1386 = shalt.err (!%p1383_p13)
}
 0x1ee   : > { %1020 = dma.vmem_to_hbm [thread:$0]  (%p2317_p7), %s2133_s12, 128, %s2131_s30, %s720_s2  }
 0x1ef PF: > { %s2318_s14 = sld [smem:[#allocation23_spill]]  ;;  %s2319_s16 = sld [smem:[#allocation37_spill]] }
 0x1f0   : > { %p1046_p11 = scmp.ge.s32.totalorder %s1525_s10, 2 }
 0x1f5   : > { %s747_s9 = sand.u32 1, %s2318_s14   ;;  %p2320_p8 = scmp.ne.s32.totalorder %s2319_s16, 0 }
 0x1f6   : > { %s748_s27 = scalar_lea.sflag [#allocation4], %s747_s9 }
 0x1f7   : > { %p1042_p0 = pnand %p1046_p11, %p2320_p8 }
 0x1f9   : > { %1468 = dma.done.wait (!%p1042_p0), %s748_s27, 128  }
 0x1fa   : > { %1470 = vsyncadd (!%p1042_p0), %s748_s27, 4294967168  ;;  %s31_s10 = sadd.s32 1, %s1525_s10   ;;  %s2322_s24 = sld [smem:[#allocation21_spill]] }
 0x1fb   : > { %p2162_p4 = scmp.ge.s32.totalorder %s31_s10, 10   ;;  %s2323_s25 = sld [smem:[#allocation22_spill]] }
 0x1fc   : > { %s2324_s26 = sld [smem:[#allocation32_spill]]  ;;  %s2325_s27 = sld [smem:[#allocation24_spill]] }
 0x1fd   : > { %s2326_s6 = sld [smem:[#allocation34_spill]]  ;;  %s2327_s30 = sld [smem:[#allocation27_spill]] }
 0x1fe   : > { %s2328_s7 = sld [smem:[#allocation28_spill]]  ;;  %s2329_s8 = sld [smem:[#allocation29_spill]] }
 0x1ff   : > { %s2330_s9 = sld [smem:[#allocation30_spill]]  ;;  %s2332_s21 = smov %s1477_s22 }
 0x200   : > { %s2333_s22 = smov %s1481_s23  ;;  %s2334_s23 = smov %s1919_s17 }
 0x201   : > { %s2335_s28 = smov %s1505_s29  ;;  %30 = sbr.rel (!%p2162_p4) target bundleno = 23 (0x17), region = 150 }
 0x203   : > { %s2336_s29 = smov %s2326_s6 }
 0x208   :  { %753 = vsyncpa [#allocation3], 1 }
 0x209   :  { %755 = vsyncpa [#allocation3 + $0x1], 1 }
 0x20a   :  { %756 = vsyncpa [#allocation6], 1 }
 0x20b   :  { %758 = vsyncpa [#allocation6 + $0x1], 1 }
 0x20c   :  { %759 = vsyncpa [#allocation9], 1 }
 0x20d   :  { %761 = vsyncpa [#allocation9 + $0x1], 1 }
 0x20e   :  { %762 = vsyncpa [#allocation12], 1 }
 0x20f   :  { %764 = vsyncpa [#allocation12 + $0x1], 1 }
 0x210   :  { %765 = vsyncpa [#allocation4], 1 }
 0x211   :  { %767 = vsyncpa [#allocation4 + $0x1], 1 }

</bundles_post_ra>
